<compile_context>
chip_gen: v6e
topology: v6e:2x2x1
jax: 0.10.0
libtpu: 0.0.40
codegen_flags: <defaults>
</compile_context>

<pallas_src>
import functools

import jax
import jax.numpy as jnp
import numpy as np
from jax.experimental import pallas as pl
from jax.experimental.pallas import tpu as pltpu

context_size = 32
embedding_dim = 64
num_heads = 4
head_size = embedding_dim // num_heads  # 16


def _mha_kernel(x_ref, wqkv_ref, wo_ref, bo_ref, o_ref, concat_ref,
                *, n_heads: int, head_size: int):
    # x_ref:    (bb, T, C)      batch block
    # wqkv_ref: (C, 3*H*hs)     fused [K | Q*scale | V] projection weights
    # wo_ref:   (C, C)          output projection (input-major, i.e. W^T)
    # bo_ref:   (1, C)          output projection bias
    # concat_ref: (bb*T, C)     VMEM scratch holding per-head outputs
    bb, T, C = x_ref.shape
    HC = n_heads * head_size          # == C

    # One lane-dense QKV matmul for all heads and all batch rows of the block.
    x = x_ref[...].reshape(bb * T, C)                       # (bb*T, C)
    kqv = jnp.dot(x, wqkv_ref[...],
                  preferred_element_type=jnp.float32)       # (bb*T, 3*C)

    # Causal additive bias generated in-kernel (no mask input / DMA).
    # Reference convention: att[k, q] is masked where q > k.
    row = jax.lax.broadcasted_iota(jnp.int32, (T, T), 0)    # k index
    col = jax.lax.broadcasted_iota(jnp.int32, (T, T), 1)    # q index
    neg_bias = jnp.where(col > row, jnp.float32(-1e30), jnp.float32(0.0))

    for b in range(bb):                       # static unroll (bb is tiny)
        r0 = b * T
        for h in range(n_heads):              # static unroll, H = 4
            c0 = h * head_size
            k = kqv[r0:r0 + T, c0:c0 + head_size]                     # (T, hs)
            q = kqv[r0:r0 + T, HC + c0:HC + c0 + head_size]           # (T, hs), pre-scaled
            v = kqv[r0:r0 + T, 2 * HC + c0:2 * HC + c0 + head_size]   # (T, hs)

            # einsum('kx,qx->kq') without an explicit transpose of q.
            att = jax.lax.dot_general(
                k, q, (((1,), (1,)), ((), ())),
                preferred_element_type=jnp.float32) + neg_bias        # (T, T)

            att_max = jnp.max(att, axis=-1, keepdims=True)
            e = jnp.exp(att - att_max)
            denom = jnp.sum(e, axis=-1, keepdims=True)
            p = e * pl.reciprocal(denom, approx=False)                # softmax

            # Place this head's output at its column offset (no concatenate).
            concat_ref[r0:r0 + T, c0:c0 + head_size] = jnp.dot(
                p, v, preferred_element_type=jnp.float32)

    # Single lane-dense output projection over the whole batch block.
    out = jnp.dot(concat_ref[...], wo_ref[...],
                  preferred_element_type=jnp.float32) + bo_ref[...]
    o_ref[...] = out.reshape(bb, T, C).astype(o_ref.dtype)


def multi_head_attention(x, wk, wq, wv, wo, bo):
    """x: (B,T,C); wk/wq/wv: (H,C,hs) pre-transposed per-head weights;
    wo: (C,C) input-major (W^T of nn.Linear); bo: (1,C)."""
    B, T, C = x.shape
    H, _, hs = wk.shape
    scale = 1.0 / jnp.sqrt(jnp.float32(C))   # reference uses 1/sqrt(embedding_dim)

    # Stack heads along the output dim and fold the scale into Q (one-time,
    # weights are constant): columns h*hs:(h+1)*hs of each block = head h.
    wk_s = wk.transpose(1, 0, 2).reshape(C, H * hs)
    wq_s = (wq * scale).transpose(1, 0, 2).reshape(C, H * hs)
    wv_s = wv.transpose(1, 0, 2).reshape(C, H * hs)
    wqkv = jnp.concatenate([wk_s, wq_s, wv_s], axis=1)      # (C, 3*H*hs)

    # Keep 2 parallel grid steps (B/2 batch rows each) so both v7x TCs are
    # used; batch rows inside a block are fused into the matmul M dimension.
    num_blocks = 2 if (B >= 2 and B % 2 == 0) else 1
    bb = B // num_blocks

    kernel = functools.partial(_mha_kernel, n_heads=H, head_size=hs)
    return pl.pallas_call(
        kernel,
        out_shape=jax.ShapeDtypeStruct((B, T, C), x.dtype),
        grid=(num_blocks,),
        in_specs=[
            pl.BlockSpec((bb, T, C), lambda i: (i, 0, 0)),        # x batch block
            pl.BlockSpec((C, 3 * H * hs), lambda i: (0, 0)),      # fused QKV weight
            pl.BlockSpec((C, C), lambda i: (0, 0)),               # output proj W
            pl.BlockSpec((1, C), lambda i: (0, 0)),               # output proj bias
        ],
        out_specs=pl.BlockSpec((bb, T, C), lambda i: (i, 0, 0)),
        scratch_shapes=[pltpu.VMEM((bb * T, C), jnp.float32)],    # head-output slab
        compiler_params=pltpu.CompilerParams(
            dimension_semantics=("parallel",)),
    )(x, wqkv, wo, bo)


def reference_mha(x, wk, wq, wv, wo, bo):
    """Pure-JAX reference mirroring the PyTorch forward exactly."""
    B, T, C = x.shape
    mask = jnp.tril(jnp.ones((T, T), dtype=jnp.float32))
    outs = []
    for h in range(wk.shape[0]):
        k = x @ wk[h]
        q = x @ wq[h]
        v = x @ wv[h]
        att = jnp.einsum('bkx,bqx->bkq', k, q) / jnp.sqrt(jnp.float32(C))
        att = jnp.where(mask[None] == 0.0, -jnp.inf, att)
        att = jax.nn.softmax(att, axis=-1)
        outs.append(jnp.einsum('btc,bce->bte', att, v))
    concat = jnp.concatenate(outs, axis=-1)
    return concat @ wo + bo


if __name__ == "__main__":
    B, T, C, H, hs = 2, context_size, embedding_dim, num_heads, head_size

    key = jax.random.PRNGKey(0)
    kx, kk, kq, kv, kw, kb = jax.random.split(key, 6)

    # Deterministic synthetic parameters (shapes follow the module __init__).
    x = jax.random.normal(kx, (B, T, C), dtype=jnp.float32)
    wk = jax.random.normal(kk, (H, C, hs), dtype=jnp.float32) * 0.05
    wq = jax.random.normal(kq, (H, C, hs), dtype=jnp.float32) * 0.05
    wv = jax.random.normal(kv, (H, C, hs), dtype=jnp.float32) * 0.05
    wo = jax.random.normal(kw, (C, C), dtype=jnp.float32) * 0.05
    bo = jax.random.normal(kb, (1, C), dtype=jnp.float32) * 0.05

    out = multi_head_attention(x, wk, wq, wv, wo, bo)
    out = jax.block_until_ready(out)

    ref = reference_mha(x, wk, wq, wv, wo, bo)
    np.testing.assert_allclose(np.asarray(out), np.asarray(ref),
                               rtol=1e-5, atol=1e-5)
    print("KERNEL_OK")
</pallas_src>

<mosaic_0001>
module attributes {stable_mosaic.version = 11 : i64} {
  func.func @_mha_kernel(%arg0: i32, %arg1: memref<1x32x64xf32, #tpu.memory_space<vmem>>, %arg2: memref<64x192xf32, #tpu.memory_space<vmem>>, %arg3: memref<64x64xf32, #tpu.memory_space<vmem>>, %arg4: memref<1x64xf32, #tpu.memory_space<vmem>>, %arg5: memref<1x32x64xf32, #tpu.memory_space<vmem>>, %arg6: memref<32x64xf32, #tpu.memory_space<vmem>>) attributes {dimension_semantics = [#tpu.dimension_semantics<parallel>], iteration_bounds = array<i64: 2>, scalar_prefetch = 0 : i64, scratch_operands = 1 : i64, tpu.core_type = #tpu.core_type<tc>, window_params = [{transform_indices = @transform_0, window_bounds = array<i64: 1, 32, 64>}, {pipeline_mode = #tpu.pipeline_mode<synchronous>, transform_indices = @transform_1, window_bounds = array<i64: 64, 192>}, {pipeline_mode = #tpu.pipeline_mode<synchronous>, transform_indices = @transform_2, window_bounds = array<i64: 64, 64>}, {pipeline_mode = #tpu.pipeline_mode<synchronous>, transform_indices = @transform_3, window_bounds = array<i64: 1, 64>}, {transform_indices = @transform_4, window_bounds = array<i64: 1, 32, 64>}]} {
    %c0 = arith.constant 0 : index
    %c0_0 = arith.constant 0 : index
    %c0_1 = arith.constant 0 : index
    %0 = vector.load %arg1[%c0, %c0_0, %c0_1] : memref<1x32x64xf32, #tpu.memory_space<vmem>>, vector<1x32x64xf32>
    %1 = vector.shape_cast %0 : vector<1x32x64xf32> to vector<32x64xf32>
    %c0_2 = arith.constant 0 : index
    %c0_3 = arith.constant 0 : index
    %2 = vector.load %arg2[%c0_2, %c0_3] : memref<64x192xf32, #tpu.memory_space<vmem>>, vector<64x192xf32>
    %cst = arith.constant dense<0.000000e+00> : vector<32x192xf32>
    %3 = tpu.matmul %1, %2, %cst {dimension_numbers = #tpu.dot_dimension_numbers<[1], [0], [0], [1], [0, 0, 1, 1], [], []>} : vector<32x64xf32>, vector<64x192xf32>, vector<32x192xf32> -> vector<32x192xf32>
    %4 = tpu.iota {dimensions = array<i32: 0>} : vector<32x32xi32>
    %5 = tpu.iota {dimensions = array<i32: 1>} : vector<32x32xi32>
    %6 = arith.cmpi sgt, %5, %4 : vector<32x32xi32>
    %cst_4 = arith.constant -1.000000e+30 : f32
    %cst_5 = arith.constant 0.000000e+00 : f32
    %7 = vector.broadcast %cst_4 : f32 to vector<32x32xf32>
    %8 = vector.broadcast %cst_5 : f32 to vector<32x32xf32>
    %9 = arith.select %6, %7, %8 : vector<32x32xi1>, vector<32x32xf32>
    %10 = vector.extract_strided_slice %3 {offsets = [0, 0], sizes = [32, 16], strides = [1, 1]} : vector<32x192xf32> to vector<32x16xf32>
    %11 = vector.extract_strided_slice %3 {offsets = [0, 64], sizes = [32, 16], strides = [1, 1]} : vector<32x192xf32> to vector<32x16xf32>
    %12 = vector.extract_strided_slice %3 {offsets = [0, 128], sizes = [32, 16], strides = [1, 1]} : vector<32x192xf32> to vector<32x16xf32>
    %cst_6 = arith.constant dense<0.000000e+00> : vector<32x32xf32>
    %13 = tpu.matmul %10, %11, %cst_6 {dimension_numbers = #tpu.dot_dimension_numbers<[1], [1], [0], [0], [0, 0, 1, 0], [], []>} : vector<32x16xf32>, vector<32x16xf32>, vector<32x32xf32> -> vector<32x32xf32>
    %14 = arith.addf %13, %9 : vector<32x32xf32>
    %cst_7 = arith.constant dense<0xFF800000> : vector<32xf32>
    %15 = vector.multi_reduction <maximumf>, %14, %cst_7 [1] : vector<32x32xf32> to vector<32xf32>
    %16 = vector.shape_cast %15 : vector<32xf32> to vector<32x1xf32>
    %17 = vector.broadcast %16 : vector<32x1xf32> to vector<32x32xf32>
    %18 = arith.subf %14, %17 : vector<32x32xf32>
    %19 = math.exp %18 : vector<32x32xf32>
    %cst_8 = arith.constant dense<0.000000e+00> : vector<32xf32>
    %20 = vector.multi_reduction <add>, %19, %cst_8 [1] : vector<32x32xf32> to vector<32xf32>
    %21 = vector.shape_cast %20 : vector<32xf32> to vector<32x1xf32>
    %22 = tpu.reciprocal %21 : vector<32x1xf32> -> vector<32x1xf32>
    %23 = vector.broadcast %22 : vector<32x1xf32> to vector<32x32xf32>
    %24 = arith.mulf %19, %23 : vector<32x32xf32>
    %cst_9 = arith.constant dense<0.000000e+00> : vector<32x16xf32>
    %25 = tpu.matmul %24, %12, %cst_9 {dimension_numbers = #tpu.dot_dimension_numbers<[1], [0], [0], [1], [0, 0, 1, 1], [], []>} : vector<32x32xf32>, vector<32x16xf32>, vector<32x16xf32> -> vector<32x16xf32>
    %c0_10 = arith.constant 0 : index
    %c0_11 = arith.constant 0 : index
    %26 = vector.load %arg6[%c0_10, %c0_11] : memref<32x64xf32, #tpu.memory_space<vmem>>, vector<32x16xf32>
    tpu.vector_store %arg6[%c0_10, %c0_11], %25 {strides = array<i32>} : memref<32x64xf32, #tpu.memory_space<vmem>>, vector<32x16xf32>,
    %27 = vector.extract_strided_slice %3 {offsets = [0, 16], sizes = [32, 16], strides = [1, 1]} : vector<32x192xf32> to vector<32x16xf32>
    %28 = vector.extract_strided_slice %3 {offsets = [0, 80], sizes = [32, 16], strides = [1, 1]} : vector<32x192xf32> to vector<32x16xf32>
    %29 = vector.extract_strided_slice %3 {offsets = [0, 144], sizes = [32, 16], strides = [1, 1]} : vector<32x192xf32> to vector<32x16xf32>
    %cst_12 = arith.constant dense<0.000000e+00> : vector<32x32xf32>
    %30 = tpu.matmul %27, %28, %cst_12 {dimension_numbers = #tpu.dot_dimension_numbers<[1], [1], [0], [0], [0, 0, 1, 0], [], []>} : vector<32x16xf32>, vector<32x16xf32>, vector<32x32xf32> -> vector<32x32xf32>
    %31 = arith.addf %30, %9 : vector<32x32xf32>
    %cst_13 = arith.constant dense<0xFF800000> : vector<32xf32>
    %32 = vector.multi_reduction <maximumf>, %31, %cst_13 [1] : vector<32x32xf32> to vector<32xf32>
    %33 = vector.shape_cast %32 : vector<32xf32> to vector<32x1xf32>
    %34 = vector.broadcast %33 : vector<32x1xf32> to vector<32x32xf32>
    %35 = arith.subf %31, %34 : vector<32x32xf32>
    %36 = math.exp %35 : vector<32x32xf32>
    %cst_14 = arith.constant dense<0.000000e+00> : vector<32xf32>
    %37 = vector.multi_reduction <add>, %36, %cst_14 [1] : vector<32x32xf32> to vector<32xf32>
    %38 = vector.shape_cast %37 : vector<32xf32> to vector<32x1xf32>
    %39 = tpu.reciprocal %38 : vector<32x1xf32> -> vector<32x1xf32>
    %40 = vector.broadcast %39 : vector<32x1xf32> to vector<32x32xf32>
    %41 = arith.mulf %36, %40 : vector<32x32xf32>
    %cst_15 = arith.constant dense<0.000000e+00> : vector<32x16xf32>
    %42 = tpu.matmul %41, %29, %cst_15 {dimension_numbers = #tpu.dot_dimension_numbers<[1], [0], [0], [1], [0, 0, 1, 1], [], []>} : vector<32x32xf32>, vector<32x16xf32>, vector<32x16xf32> -> vector<32x16xf32>
    %c0_16 = arith.constant 0 : index
    %c16 = arith.constant 16 : index
    %43 = vector.load %arg6[%c0_16, %c16] : memref<32x64xf32, #tpu.memory_space<vmem>>, vector<32x16xf32>
    tpu.vector_store %arg6[%c0_16, %c16], %42 {strides = array<i32>} : memref<32x64xf32, #tpu.memory_space<vmem>>, vector<32x16xf32>,
    %44 = vector.extract_strided_slice %3 {offsets = [0, 32], sizes = [32, 16], strides = [1, 1]} : vector<32x192xf32> to vector<32x16xf32>
    %45 = vector.extract_strided_slice %3 {offsets = [0, 96], sizes = [32, 16], strides = [1, 1]} : vector<32x192xf32> to vector<32x16xf32>
    %46 = vector.extract_strided_slice %3 {offsets = [0, 160], sizes = [32, 16], strides = [1, 1]} : vector<32x192xf32> to vector<32x16xf32>
    %cst_17 = arith.constant dense<0.000000e+00> : vector<32x32xf32>
    %47 = tpu.matmul %44, %45, %cst_17 {dimension_numbers = #tpu.dot_dimension_numbers<[1], [1], [0], [0], [0, 0, 1, 0], [], []>} : vector<32x16xf32>, vector<32x16xf32>, vector<32x32xf32> -> vector<32x32xf32>
    %48 = arith.addf %47, %9 : vector<32x32xf32>
    %cst_18 = arith.constant dense<0xFF800000> : vector<32xf32>
    %49 = vector.multi_reduction <maximumf>, %48, %cst_18 [1] : vector<32x32xf32> to vector<32xf32>
    %50 = vector.shape_cast %49 : vector<32xf32> to vector<32x1xf32>
    %51 = vector.broadcast %50 : vector<32x1xf32> to vector<32x32xf32>
    %52 = arith.subf %48, %51 : vector<32x32xf32>
    %53 = math.exp %52 : vector<32x32xf32>
    %cst_19 = arith.constant dense<0.000000e+00> : vector<32xf32>
    %54 = vector.multi_reduction <add>, %53, %cst_19 [1] : vector<32x32xf32> to vector<32xf32>
    %55 = vector.shape_cast %54 : vector<32xf32> to vector<32x1xf32>
    %56 = tpu.reciprocal %55 : vector<32x1xf32> -> vector<32x1xf32>
    %57 = vector.broadcast %56 : vector<32x1xf32> to vector<32x32xf32>
    %58 = arith.mulf %53, %57 : vector<32x32xf32>
    %cst_20 = arith.constant dense<0.000000e+00> : vector<32x16xf32>
    %59 = tpu.matmul %58, %46, %cst_20 {dimension_numbers = #tpu.dot_dimension_numbers<[1], [0], [0], [1], [0, 0, 1, 1], [], []>} : vector<32x32xf32>, vector<32x16xf32>, vector<32x16xf32> -> vector<32x16xf32>
    %c0_21 = arith.constant 0 : index
    %c32 = arith.constant 32 : index
    %60 = vector.load %arg6[%c0_21, %c32] : memref<32x64xf32, #tpu.memory_space<vmem>>, vector<32x16xf32>
    tpu.vector_store %arg6[%c0_21, %c32], %59 {strides = array<i32>} : memref<32x64xf32, #tpu.memory_space<vmem>>, vector<32x16xf32>,
    %61 = vector.extract_strided_slice %3 {offsets = [0, 48], sizes = [32, 16], strides = [1, 1]} : vector<32x192xf32> to vector<32x16xf32>
    %62 = vector.extract_strided_slice %3 {offsets = [0, 112], sizes = [32, 16], strides = [1, 1]} : vector<32x192xf32> to vector<32x16xf32>
    %63 = vector.extract_strided_slice %3 {offsets = [0, 176], sizes = [32, 16], strides = [1, 1]} : vector<32x192xf32> to vector<32x16xf32>
    %cst_22 = arith.constant dense<0.000000e+00> : vector<32x32xf32>
    %64 = tpu.matmul %61, %62, %cst_22 {dimension_numbers = #tpu.dot_dimension_numbers<[1], [1], [0], [0], [0, 0, 1, 0], [], []>} : vector<32x16xf32>, vector<32x16xf32>, vector<32x32xf32> -> vector<32x32xf32>
    %65 = arith.addf %64, %9 : vector<32x32xf32>
    %cst_23 = arith.constant dense<0xFF800000> : vector<32xf32>
    %66 = vector.multi_reduction <maximumf>, %65, %cst_23 [1] : vector<32x32xf32> to vector<32xf32>
    %67 = vector.shape_cast %66 : vector<32xf32> to vector<32x1xf32>
    %68 = vector.broadcast %67 : vector<32x1xf32> to vector<32x32xf32>
    %69 = arith.subf %65, %68 : vector<32x32xf32>
    %70 = math.exp %69 : vector<32x32xf32>
    %cst_24 = arith.constant dense<0.000000e+00> : vector<32xf32>
    %71 = vector.multi_reduction <add>, %70, %cst_24 [1] : vector<32x32xf32> to vector<32xf32>
    %72 = vector.shape_cast %71 : vector<32xf32> to vector<32x1xf32>
    %73 = tpu.reciprocal %72 : vector<32x1xf32> -> vector<32x1xf32>
    %74 = vector.broadcast %73 : vector<32x1xf32> to vector<32x32xf32>
    %75 = arith.mulf %70, %74 : vector<32x32xf32>
    %cst_25 = arith.constant dense<0.000000e+00> : vector<32x16xf32>
    %76 = tpu.matmul %75, %63, %cst_25 {dimension_numbers = #tpu.dot_dimension_numbers<[1], [0], [0], [1], [0, 0, 1, 1], [], []>} : vector<32x32xf32>, vector<32x16xf32>, vector<32x16xf32> -> vector<32x16xf32>
    %c0_26 = arith.constant 0 : index
    %c48 = arith.constant 48 : index
    %77 = vector.load %arg6[%c0_26, %c48] : memref<32x64xf32, #tpu.memory_space<vmem>>, vector<32x16xf32>
    tpu.vector_store %arg6[%c0_26, %c48], %76 {strides = array<i32>} : memref<32x64xf32, #tpu.memory_space<vmem>>, vector<32x16xf32>,
    %c0_27 = arith.constant 0 : index
    %c0_28 = arith.constant 0 : index
    %78 = vector.load %arg6[%c0_27, %c0_28] : memref<32x64xf32, #tpu.memory_space<vmem>>, vector<32x64xf32>
    %c0_29 = arith.constant 0 : index
    %c0_30 = arith.constant 0 : index
    %79 = vector.load %arg3[%c0_29, %c0_30] : memref<64x64xf32, #tpu.memory_space<vmem>>, vector<64x64xf32>
    %cst_31 = arith.constant dense<0.000000e+00> : vector<32x64xf32>
    %80 = tpu.matmul %78, %79, %cst_31 {dimension_numbers = #tpu.dot_dimension_numbers<[1], [0], [0], [1], [0, 0, 1, 1], [], []>} : vector<32x64xf32>, vector<64x64xf32>, vector<32x64xf32> -> vector<32x64xf32>
    %c0_32 = arith.constant 0 : index
    %c0_33 = arith.constant 0 : index
    %81 = vector.load %arg4[%c0_32, %c0_33] : memref<1x64xf32, #tpu.memory_space<vmem>>, vector<1x64xf32>
    %82 = vector.broadcast %81 : vector<1x64xf32> to vector<32x64xf32>
    %83 = arith.addf %80, %82 : vector<32x64xf32>
    %84 = vector.shape_cast %83 : vector<32x64xf32> to vector<1x32x64xf32>
    %c0_34 = arith.constant 0 : index
    %c0_35 = arith.constant 0 : index
    %c0_36 = arith.constant 0 : index
    %85 = vector.load %arg5[%c0_34, %c0_35, %c0_36] : memref<1x32x64xf32, #tpu.memory_space<vmem>>, vector<1x32x64xf32>
    tpu.vector_store %arg5[%c0_34, %c0_35, %c0_36], %84 {strides = array<i32>} : memref<1x32x64xf32, #tpu.memory_space<vmem>>, vector<1x32x64xf32>,
    return
  }
  func.func @transform_0(%arg0: i32) -> (i32, i32, i32) {
    %c0_i32 = arith.constant 0 : i32
    %c0_i32_0 = arith.constant 0 : i32
    %c0_i32_1 = arith.constant 0 : i32
    return %arg0, %c0_i32, %c0_i32_0 : i32, i32, i32
  }
  func.func @transform_1(%arg0: i32) -> (i32, i32) {
    %c0_i32 = arith.constant 0 : i32
    %c0_i32_0 = arith.constant 0 : i32
    %c0_i32_1 = arith.constant 0 : i32
    return %c0_i32, %c0_i32_0 : i32, i32
  }
  func.func @transform_2(%arg0: i32) -> (i32, i32) {
    %c0_i32 = arith.constant 0 : i32
    %c0_i32_0 = arith.constant 0 : i32
    %c0_i32_1 = arith.constant 0 : i32
    return %c0_i32, %c0_i32_0 : i32, i32
  }
  func.func @transform_3(%arg0: i32) -> (i32, i32) {
    %c0_i32 = arith.constant 0 : i32
    %c0_i32_0 = arith.constant 0 : i32
    %c0_i32_1 = arith.constant 0 : i32
    return %c0_i32, %c0_i32_0 : i32, i32
  }
  func.func @transform_4(%arg0: i32) -> (i32, i32, i32) {
    %c0_i32 = arith.constant 0 : i32
    %c0_i32_0 = arith.constant 0 : i32
    %c0_i32_1 = arith.constant 0 : i32
    return %arg0, %c0_i32, %c0_i32_0 : i32, i32, i32
  }
}

</mosaic_0001>

<bundles_post_ra>
// kernel: tpu_custom_call.1
= control target key start
LH: loop header
LB: loop body
LE: loop exit
PB: predicated region body
PF: predicated region fallthrough
CT: control target
= control target key end

     0   :  { %9 = vsyncpa [#allocation4], 0  ;;  %s2933_s0 = inlined_call_operand.hbm [shape: f32[2,32,64], index: 0, kind: input, shape index: {}]   ;;  %s2934_s1 = inlined_call_operand.hbm [shape: f32[64,192], index: 1, kind: input, shape index: {}]   ;;  %s2935_s2 = inlined_call_operand.hbm [shape: f32[64,64], index: 2, kind: input, shape index: {}]   ;;  %s2936_s3 = inlined_call_operand.vmem [shape: f32[1,64], index: 3, kind: input, shape index: {}]   ;;  %s2937_s4 = inlined_call_operand.hbm [shape: f32[2,32,64], index: 4, kind: output, shape index: {}]  }
   0x1   :  { %11 = vsyncpa [#allocation4 + $0x1], 0 }
   0x2   :  { %12 = vsyncpa [#allocation7], 0 }
   0x3   :  { %13 = vsyncpa [#allocation5], 0 }
   0x4   :  { %15 = vsyncpa [#allocation5 + $0x1], 0  ;;  %s2370_s15 = smov 0   ;;  %s2372_s16 = smov 0  }
   0x5   :  { %s2374_s17 = smov 0   ;;  %s2376_s18 = smov 0  }
   0x6 LB: > { %s2391_s19 = sadd.s32 4294967295, %s2325_s18   ;;  %s1745_s20 = sadd.s32 4294967294, %s2325_s18   ;;  %s2325_s18 = sphi %s2376_s18, %s2959_s18   ;;  %s2321_s17 = sphi %s2374_s17, %s2958_s17   ;;  %s2317_s16 = sphi %s2372_s16, %s2957_s16   ;;  %s2313_s15 = sphi %s2370_s15, %s2956_s15  }
   0x7   : > { %p41_p0 = scmp.ne.s32.totalorder %s2317_s16, %s2313_s15  ;;  %p2938_p1 = scmp.eq.s32.totalorder %s2391_s19, 0 }
   0x8   : > { %p134_p3 = scmp.eq.s32.totalorder %s1745_s20, 1  ;;  %p1746_p5 = scmp.ge.s32.totalorder %s2325_s18, 1 }
   0x9   : > { %p2400_p4 = por %p2938_p1, %p41_p0  ;;  %p141_p7 = scmp.lt.s32.totalorder %s2325_s18, 3 }
   0xa   : > { %p2405_p6 = por %p134_p3, %p41_p0  ;;  %s2327_s24 = smov [#allocation6]  }
   0xb   : > { %s2942_s21 = scalar_select %p2400_p4, 1, 0 }
   0xc   : > { %s2943_s22 = scalar_select %p2405_p6, 1, 0 }
   0xd   : > { %p2410_p8 = pnand %p1746_p5, %p141_p7  ;;  %s153_s25 = sshll.u32 %s2327_s24, 4  ;;  %s154_s25 = int_to_ptr.vmem [resolvable:$true] %s153_s25 }
   0xe   : > { %s2328_s27 = smov [#allocation8]   ;;  %s2188_s29 = scalar_lea.vmem %s154_s25, 2048 }
   0xf   : > { %s2944_s23 = scalar_select %p2410_p8, 1, 0 }
  0x10   : > { %p2044_p9 = pneg %p2410_p8  ;;  %s166_s28 = sshll.u32 %s2328_s27, 4  ;;  %s167_s28 = int_to_ptr.vmem [resolvable:$true] %s166_s28 }
  0x11   : > { %p2189_p13 = scmp.ne.s32.totalorder %s154_s25, %s2188_s29  ;;  %p2196_p5 = scmp.lt.s32.totalorder %s154_s25, %s154_s25 }
  0x12   : > { %p2419_p11 = pnand %p2044_p9, %p2938_p1  ;;  %p2197_p7 = scmp.lt.s32.totalorder %s2188_s29, %s2188_s29 }
  0x14   : > { %p2179_p12 = pneg %p2419_p11  ;;  %p2198_p10 = por %p2197_p7, %p2196_p5 }
  0x16   : > { %p2191_p0 = pnand %p2189_p13, %p2179_p12 }
  0x18   : > { %p2192_p3 = pneg %p2191_p0 }
  0x1a   : > { %p2199_p9 = pnand %p2198_p10, %p2192_p3 }
  0x1c   : > { %2202 = shalt.err (!%p2199_p9)
}
  0x1d   : > { %s2329_s30 = smov 256   ;;  %s2330_s5 = smov 16  }
  0x1e   : > { %2047 = dma.hbm_to_vmem [thread:$0]  (!%p2419_p11), %s2934_s1, 2048, %s154_s25, [#allocation7], %s2329_s30, %s2329_s30, %s2330_s5  }
  0x1f   : > { %s2214_s8 = scalar_lea.vmem %s167_s28, 1024  ;;  %p2222_p2 = scmp.lt.s32.totalorder %s167_s28, %s167_s28 }
  0x20   : > { %p2215_p1 = scmp.ne.s32.totalorder %s167_s28, %s2214_s8  ;;  %p2223_p6 = scmp.lt.s32.totalorder %s2214_s8, %s2214_s8 }
  0x22   : > { %p2217_p13 = pnand %p2215_p1, %p2179_p12  ;;  %p2224_p5 = por %p2223_p6, %p2222_p2 }
  0x24   : > { %p2218_p0 = pneg %p2217_p13 }
  0x26   : > { %p2225_p10 = pnand %p2224_p5, %p2218_p0 }
  0x28   : > { %2228 = shalt.err (!%p2225_p10)
}
  0x29   : > { %s2331_s9 = smov 128   ;;  %s2332_s10 = smov 8  }
  0x2a   : > { %2050 = dma.hbm_to_vmem [thread:$0]  (!%p2419_p11), %s2935_s2, 1024, %s167_s28, [#allocation7], %s2331_s9, %s2331_s9, %s2332_s10  }
  0x2b   : > { %s2445_s13 = sadd.s32 1, %s2325_s18   ;;  %s28_s20 = sadd.s32 1, %s2321_s17 }
  0x2c   : > { %s25_s14 = ssub.s32 %s2325_s18, %s2445_s13  ;;  %p35_p2 = scmp.ne.s32.totalorder %s2321_s17, %s2317_s16 }
  0x2d   : > { %p26_p1 = scmp.eq.s32.totalorder %s25_s14, 0  ;;  %p36_p6 = scmp.eq.s32.totalorder %s2325_s18, 0 }
  0x2e   : > { %p2946_p3 = scmp.eq.s32.totalorder %s2391_s19, 1  ;;  %p2061_p9 = scmp.lt.s32.totalorder %s2325_s18, 2 }
  0x2f   : > { %s2454_s24 = scalar_select %p26_p1, %s2321_s17, %s28_s20  }
  0x30   : > { %p37_p12 = por %p36_p6, %p35_p2  ;;  %p2458_p7 = por %p2946_p3, %p35_p2 }
  0x31   : > { %s183_s26 = sand.u32 1, %s2321_s17   ;;  %s1820_s28 = sshll.u32 %s2325_s18, 9 }
  0x32   : > { %s2947_s25 = scalar_select %p2458_p7, 1, 0 }
  0x33   : > { %s1750_s27 = sshll.u32 %s183_s26, 5  ;;  %s2468_s5 = scalar_lea.hbm %s2933_s0, %s1820_s28 }
  0x34   : > { %s187_s6 = scalar_lea.vmem [#allocation3], %s1750_s27  ;;  %p2472_p11 = pnand %p2061_p9, %p37_p12 }
  0x35   : > { %s194_s7 = sshll.u32 %s187_s6, 4  ;;  %s2476_s11 = scalar_lea.sflag [#allocation4], %s183_s26  ;;  %s2470_s7 = int_to_ptr.vmem [resolvable:$true] %s194_s7 }
  0x36   : > { %s2229_s12 = scalar_lea.hbm %s2468_s5, 512  ;;  %p2231_p0 = pneg %p2472_p11 }
  0x37   : > { %p2230_p13 = scmp.ne.s32.totalorder %s2468_s5, %s2229_s12  ;;  %s2234_s27 = scalar_lea.hbm %s2933_s0, 1024 }
  0x38   : > { %p2235_p1 = scmp.lt.s32.totalorder %s2468_s5, %s2933_s0  ;;  %p2236_p2 = scmp.lt.s32.totalorder %s2234_s27, %s2229_s12 }
  0x39   : > { %p2232_p5 = pnand %p2231_p0, %p2230_p13 }
  0x3a   : > { %p2237_p6 = por %p2236_p2, %p2235_p1 }
  0x3b   : > { %p2233_p10 = pneg %p2232_p5 }
  0x3d   : > { %p2238_p12 = pnand %p2237_p6, %p2233_p10 }
  0x3f   : > { %2241 = shalt.err (!%p2238_p12)
}
  0x40   : > { %s2242_s26 = scalar_lea.vmem %s2470_s7, 512  ;;  %s2333_s30 = smov [#allocation3]  }
  0x41   : > { %p2243_p3 = scmp.ne.s32.totalorder %s2470_s7, %s2242_s26  ;;  %s2247_s6 = sshll.u32 %s2333_s30, 4  ;;  %s2248_s6 = int_to_ptr.vmem [resolvable:$false] %s2247_s6 }
  0x42   : > { %s2249_s14 = scalar_lea.vmem %s2248_s6, 1024  ;;  %p2250_p5 = scmp.lt.s32.totalorder %s2470_s7, %s2248_s6 }
  0x43   : > { %p2245_p9 = pnand %p2243_p3, %p2231_p0  ;;  %p2251_p7 = scmp.lt.s32.totalorder %s2249_s14, %s2242_s26 }
  0x45   : > { %p2246_p13 = pneg %p2245_p9  ;;  %p2252_p4 = por %p2251_p7, %p2250_p5 }
  0x47   : > { %p2253_p8 = pnand %p2252_p4, %p2246_p13 }
  0x49   : > { %2256 = shalt.err (!%p2253_p8)
}
  0x4a   : > { %2054 = dma.hbm_to_vmem [thread:$0]  (!%p2472_p11), %s2468_s5, 512, %s2470_s7, %s2476_s11, %s2331_s9, %s2331_s9, %s2332_s10  }
  0x4b   : > { %p2949_p0 = scmp.ne.s32.totalorder %s2944_s23, 0 }
  0x4c   : > { %s2503_s12 = sand.u32 (!%p2949_p0), 1, %s2317_s16   ;;  %p2950_p4 = scmp.ne.s32.totalorder (!%p2949_p0), %s2942_s21, 0 }
  0x4d   : > { %206 = sbr.rel (%p2949_p0) target bundleno = 2168 (0x878), region = 36  ;;  %s1754_s20 = sshll.u32 (!%p2949_p0), %s2503_s12, 5 }
  0x4e   : > { %s209_s27 = scalar_lea.sflag (!%p2949_p0), [#allocation4], %s2503_s12  ;;  %s2509_s8 = scalar_lea.vmem (!%p2949_p0), [#allocation3], %s1754_s20 }
  0x52   : > { %2300 = dma.done.wait (%p2950_p4), %s209_s27, 512  }
  0x53   : > { %2302 = vsyncadd (%p2950_p4), %s209_s27, 4294966784  ;;  %p2951_p8 = scmp.eq.s32.totalorder %s2391_s19, 0 }
  0x55   : > { %2304 = dma.done.wait (%p2951_p8), [#allocation7], 3072   ;;  %p2952_p7 = pmov %p2951_p8 }
  0x56   : > { %v2334_v0 = vmov 0.0   ;;  %v264_v1 = vld [vmem:[#allocation6 + $0x78] sm:$0xff]  ;;  %v263_v2 = vld [vmem:[#allocation6 + $0x70] sm:$0xff]  ;;  %v262_v3 = vld [vmem:[#allocation6 + $0x68] sm:$0xff]  ;;  %vm265_vm0 = vcmask 523264   ;;  %vm394_vm1 = vcmask 130048   ;;  %v367_v49 = vlaneseq }
  0x57   : > { %2306 = vsyncadd (%p2952_p7), [#allocation7], 4294964224  ;;  %342 = vmatprep.mubr.f32.mxu0 %v2334_v0  ;;  %294 = vmatprep.subr.mxu0 %v264_v1  ;;  %v261_v4 = vld [vmem:[#allocation6 + $0x60] sm:$0xff]  ;;  %v260_v5 = vld [vmem:[#allocation6 + $0x58] sm:$0xff]  ;;  %s2335_s21 = smov 64   ;;  %s2336_s23 = smov 48  }
  0x58   : > { %295 = vmatpush1.msra.mxu0 %v263_v2  ;;  %v259_v6 = vld [vmem:[#allocation6 + $0x50] sm:$0xff]  ;;  %v258_v7 = vld [vmem:[#allocation6 + $0x48] sm:$0xff]  ;;  %v257_v8 = vld [vmem:[#allocation6 + $0x40] sm:$0xff]  ;;  %s2337_s9 = smov 32   ;;  %s2338_s10 = smov 112   ;;  %v368_v50 = vshrl.u32 %v367_v49, 7 }
  0x59   : > { %296 = vmatprep.subr.mxu0 %v262_v3  ;;  %v256_v9 = vld [vmem:[#allocation6 + $0x38] sm:$0xff]  ;;  %v255_v10 = vld [vmem:[#allocation6 + $0x30] sm:$0xff]  ;;  %v254_v11 = vld [vmem:[#allocation6 + $0x28] sm:$0xff]  ;;  %s2339_s5 = smov 96   ;;  %v373_v52 = vand.u32 127, %v367_v49  ;;  %vm496_vm3 = vcmask 261120  }
  0x5a   : > { %297 = vmatpush1.msra.mxu0 %v261_v4  ;;  %v253_v12 = vld [vmem:[#allocation6 + $0x20] sm:$0xff]  ;;  %v252_v13 = vld [vmem:[#allocation6 + $0x18] sm:$0xff]  ;;  %v251_v14 = vld [vmem:[#allocation6 + $0x10] sm:$0xff]  ;;  %v369_v51 = vadd.s32 8, %v368_v50  ;;  %v371_v56 = vadd.s32 24, %v368_v50  ;;  %v370_v62 = vadd.s32 16, %v368_v50 }
  0x5b   : > { %298 = vmatprep.subr.mxu0 %v260_v5  ;;  %v250_v15 = vld [vmem:[#allocation6 + $0x8] sm:$0xff]  ;;  %v249_v16 = vld [vmem:[#allocation6] sm:$0xff]  ;;  %v247_v19 = vld [vmem:[%s2509_s8 + $0x10] sm:$0xff]  ;;  %vm374_vm4 = vcmp.gt.s32.totalorder %v373_v52, %v368_v50  ;;  %s2340_s7 = smov 16   ;;  %s2341_s11 = smov 80   ;;  %vm932_vm7 = vcmask 261248  }
  0x5c   : > { %299 = vmatpush1.msra.mxu0 %v259_v6  ;;  %v245_v17 = vld [vmem:[%s2509_s8] sm:$0xff]  ;;  %v246_v18 = vld [vmem:[%s2509_s8 + $0x8] sm:$0xff]  ;;  %v248_v20 = vld [vmem:[%s2509_s8 + $0x18] sm:$0xff]  ;;  %vm375_vm2 = vcmp.gt.s32.totalorder %v373_v52, %v369_v51  ;;  %v2640_v58 = vsel %vm374_vm4, -1e+30, %v2334_v0  ;;  %vm377_vm5 = vcmp.gt.s32.totalorder %v373_v52, %v371_v56  ;;  %vm376_vm6 = vcmp.gt.s32.totalorder %v373_v52, %v370_v62  ;;  %s244_s26 = scalar_lea.vmem [#allocation9], %s1754_s20 }
  0x5d   : > { %300 = vmatprep.subr.mxu0 %v258_v7  ;;  %v2632_v53 = vsel %vm375_vm2, -1e+30, %v2334_v0  ;;  %v2651_v4 = vsel %vm377_vm5, -1e+30, %v2334_v0  ;;  %vm1223_vm8 = vcmask 392448   ;;  %vm1514_vm9 = vcmask 523648  }
  0x5e   : > { %301 = vmatpush1.msra.mxu0 %v257_v8  ;;  %s1653_s30 = sshll.u32 %s244_s26, 4  ;;  %s1821_s6 = sshll.u32 %s2391_s19, 9  ;;  %s2883_s30 = int_to_ptr.vmem [resolvable:$true] %s1653_s30 }
  0x5f   : > { %302 = vmatprep.subr.mxu0 %v256_v9  ;;  %s2888_s20 = scalar_lea.hbm %s2937_s4, %s1821_s6  ;;  %s1640_s8 = scalar_lea.sflag [#allocation5], %s2503_s12 }
  0x60   : > { %303 = vmatpush1.msra.mxu0 %v255_v10  ;;  %v2659_v10 = vsel %vm376_vm6, -1e+30, %v2334_v0  ;;  %s2257_s19 = scalar_lea.vmem %s2883_s30, 512  ;;  %p2953_p10 = scmp.ne.s32.totalorder %s2947_s25, 0 }
  0x61   : > { %304 = vmatprep.subr.mxu0 %v254_v11  ;;  %p2258_p11 = scmp.ne.s32.totalorder %s2883_s30, %s2257_s19 }
  0x62   : > { %305 = vmatpush1.msra.mxu0 %v253_v12 }
  0x63   : > { %306 = vmatprep.subr.mxu0 %v252_v13  ;;  %p2259_p1 = pnand %p2258_p11, %p2953_p10 }
  0x64   : > { %307 = vmatpush1.msra.mxu0 %v251_v14 }
  0x65   : > { %308 = vmatprep.subr.mxu0 %v250_v15  ;;  %p2260_p2 = pneg %p2259_p1 }
  0x66   : > { %309 = vmatpush1.msra.mxu0 %v249_v16 }
  0x67   : > { %1758 = vmatmul.mubr.msk.f32.vlgmr.msra.gmra.mxu0 %vm265_vm0, %v245_v17 }
  0x68   : > { %348 = vmatprep.mubr.f32.mxu0 %v2334_v0 }
  0x6b   : > { %1759 = vmatmul.mubr.msk.f32.gmra.mxu0 %vm265_vm0, %v246_v18 }
  0x6c   : > { %354 = vmatprep.mubr.f32.mxu0 %v2334_v0 }
  0x6f   : > { %1760 = vmatmul.mubr.msk.f32.gmra.mxu0 %vm265_vm0, %v247_v19 }
  0x70   : > { %360 = vmatprep.mubr.f32.mxu0 %v2334_v0 }
  0x73   : > { %1761 = vmatmul.mubr.msk.f32.gmra.mxu0 %vm265_vm0, %v248_v20 }
 0x127   : > { %v2531_v21 = vpop.f32.mrf.mxu0 }
 0x128   : > { %1906 = vmatprep.mubr.msk.f32.mxu1 %vm394_vm1, %v2531_v21 }
 0x129   : > { %v2535_v22 = vpop.f32.mrf.mxu0 }
 0x12b   : > { %v2537_v23 = vpop.f32.mrf.mxu0 }
 0x12d   : > { %v2539_v24 = vpop.f32.mrf.mxu0 }
 0x12f   : > { %v2541_v25 = vpop.f32.mrf.mxu0 }
 0x130   : > { %390 = vrot.lane.b32.xlu1 %v2541_v25, %s2335_s21 }
 0x131   : > { %v2544_v26 = vpop.f32.mrf.mxu0 }
 0x133   : > { %v2546_v27 = vpop.f32.mrf.mxu0 }
 0x134   : > { %654 = vrot.lane.b32.xlu1 %v2541_v25, %s2336_s23  ;;  %392 = vrot.lane.b32.xlu0 %v2546_v27, %s2335_s21 }
 0x135   : > { %v2595_v37 = vpop.f32.mrf.mxu0 }
 0x138   : > { %652 = vrot.lane.b32.xlu1 %v2537_v23, %s2336_s23  ;;  %656 = vrot.lane.b32.xlu0 %v2546_v27, %s2336_s23 }
 0x13c   : > { %650 = vrot.lane.b32.xlu1 %v2531_v21, %s2336_s23  ;;  %388 = vrot.lane.b32.xlu0 %v2537_v23, %s2335_s21 }
 0x140   : > { %951 = vrot.lane.b32.xlu1 %v2546_v27, %s2337_s9  ;;  %386 = vrot.lane.b32.xlu0 %v2531_v21, %s2335_s21  ;;  %s2342_s21 = smov [#allocation9]  }
 0x144   : > { %949 = vrot.lane.b32.xlu1 %v2541_v25, %s2337_s9  ;;  %642 = vrot.lane.b32.xlu0 %v2531_v21, %s2338_s10 }
 0x148   : > { %646 = vrot.lane.b32.xlu1 %v2541_v25, %s2338_s10  ;;  %644 = vrot.lane.b32.xlu0 %v2537_v23, %s2338_s10 }
 0x14c   : > { %945 = vrot.lane.b32.xlu1 %v2531_v21, %s2337_s9  ;;  %947 = vrot.lane.b32.xlu0 %v2537_v23, %s2337_s9 }
 0x150   : > { %939 = vrot.lane.b32.xlu1 %v2537_v23, %s2339_s5  ;;  %648 = vrot.lane.b32.xlu0 %v2546_v27, %s2338_s10 }
 0x154   : > { %943 = vrot.lane.b32.xlu1 %v2546_v27, %s2339_s5  ;;  %937 = vrot.lane.b32.xlu0 %v2531_v21, %s2339_s5 }
 0x158   : > { %941 = vrot.lane.b32.xlu0 %v2541_v25, %s2339_s5 }
 0x1a2   : > { %v391_v28 = vpop.permute.xlu1 %390 }
 0x1a6   : > { %v655_v29 = vpop.permute.xlu1 %654  ;;  %v393_v30 = vpop.permute.xlu0 %392 }
 0x1a7   : > { %1898 = vmatprep.subr.msk.mxu1 %vm394_vm1, %v393_v30 }
 0x1a8   : > { %1899 = vmatpush3.xpose.msk.msra.mxu1 %vm394_vm1, %v393_v30 }
 0x1a9   : > { %1900 = vmatprep.subr.msk.mxu1 %vm394_vm1, %v391_v28 }
 0x1aa   : > { %v653_v31 = vpop.permute.xlu1 %652  ;;  %v657_v32 = vpop.permute.xlu0 %656 }
 0x1ab   : > { %1926 = vmatprep.subr.msk.mxu0 %vm394_vm1, %v657_v32 }
 0x1ac   : > { %1901 = vmatpush3.xpose.msk.msra.mxu1 %vm394_vm1, %v391_v28  ;;  %1927 = vmatpush3.xpose.msk.msra.mxu0 %vm394_vm1, %v657_v32 }
 0x1ad   : > { %1928 = vmatprep.subr.msk.mxu0 %vm394_vm1, %v655_v29 }
 0x1ae   : > { %v651_v33 = vpop.permute.xlu1 %650  ;;  %v389_v34 = vpop.permute.xlu0 %388 }
 0x1af   : > { %1902 = vmatprep.subr.msk.mxu1 %vm394_vm1, %v389_v34 }
 0x1b0   : > { %1903 = vmatpush3.xpose.msk.msra.mxu1 %vm394_vm1, %v389_v34  ;;  %1929 = vmatpush3.xpose.msk.msra.mxu0 %vm394_vm1, %v655_v29 }
 0x1b1   : > { %1930 = vmatprep.subr.msk.mxu0 %vm394_vm1, %v653_v31 }
 0x1b2   : > { %v952_v35 = vpop.permute.xlu1 %951  ;;  %v387_v36 = vpop.permute.xlu0 %386 }
 0x1b3   : > { %1904 = vmatprep.subr.msk.mxu1 %vm394_vm1, %v387_v36 }
 0x1b4   : > { %1905 = vmatpush3.xpose.msk.msra.mxu1 %vm394_vm1, %v387_v36  ;;  %1931 = vmatpush3.xpose.msk.msra.mxu0 %vm394_vm1, %v653_v31 }
 0x1b5   : > { %1912 = vmatprep.subr.mxu1 %v2595_v37  ;;  %1932 = vmatprep.subr.msk.mxu0 %vm394_vm1, %v651_v33 }
 0x1b6   : > { %v950_v38 = vpop.permute.xlu1 %949  ;;  %v643_v39 = vpop.permute.xlu0 %642 }
 0x1b7   : > { %1907 = vmatmul.mubr.msk.f32.vlgmr.msra.gmra.mxu1 %vm394_vm1, %v2537_v23  ;;  %1934 = vmatprep.mubr.msk.f32.mxu0 %vm394_vm1, %v643_v39 }
 0x1b8   : > { %1909 = vmatprep.mubr.msk.f32.mxu1 %vm394_vm1, %v2541_v25  ;;  %1913 = vmatpush3.msra.mxu1 %v2595_v37 }
 0x1b9   : > { %1933 = vmatpush3.xpose.msk.msra.mxu0 %vm394_vm1, %v651_v33  ;;  %1914 = vmatprep.subr.mxu1 %v2544_v26 }
 0x1ba   : > { %1954 = vmatprep.subr.msk.mxu0 %vm394_vm1, %v952_v35  ;;  %v647_v40 = vpop.permute.xlu1 %646  ;;  %v645_v41 = vpop.permute.xlu0 %644  ;;  %1915 = vmatpush3.msra.mxu1 %v2544_v26 }
 0x1bb   : > { %1910 = vmatmul.mubr.msk.f32.gmra.mxu1 %vm394_vm1, %v2546_v27  ;;  %1916 = vmatprep.subr.mxu1 %v2539_v24 }
 0x1bc   : > { %1935 = vmatmul.mubr.msk.f32.vlgmr.msra.gmra.mxu0 %vm394_vm1, %v645_v41  ;;  %1917 = vmatpush3.msra.mxu1 %v2539_v24 }
 0x1bd   : > { %1937 = vmatprep.mubr.msk.f32.mxu0 %vm394_vm1, %v647_v40  ;;  %1955 = vmatpush3.xpose.msk.msra.mxu0 %vm394_vm1, %v952_v35 }
 0x1be   : > { %1918 = vmatprep.subr.mxu1 %v2535_v22  ;;  %1956 = vmatprep.subr.msk.mxu0 %vm394_vm1, %v950_v38  ;;  %v948_v42 = vpop.permute.xlu0 %947  ;;  %v946_v44 = vpop.permute.xlu1 %945 }
 0x1bf   : > { %1919 = vmatpush3.msra.mxu1 %v2535_v22 }
 0x1c1   : > { %1957 = vmatpush3.xpose.msk.msra.mxu0 %vm394_vm1, %v950_v38 }
 0x1c2   : > { %1958 = vmatprep.subr.msk.mxu0 %vm394_vm1, %v948_v42  ;;  %v649_v43 = vpop.permute.xlu0 %648  ;;  %v940_v46 = vpop.permute.xlu1 %939 }
 0x1c3   : > { %1938 = vmatmul.mubr.msk.f32.gmra.mxu0 %vm394_vm1, %v649_v43 }
 0x1c5   : > { %1959 = vmatpush3.xpose.msk.msra.mxu0 %vm394_vm1, %v948_v42 }
 0x1c6   : > { %1960 = vmatprep.subr.msk.mxu0 %vm394_vm1, %v946_v44  ;;  %v938_v45 = vpop.permute.xlu0 %937  ;;  %v944_v48 = vpop.permute.xlu1 %943 }
 0x1c7   : > { %1962 = vmatprep.mubr.msk.f32.mxu0 %vm394_vm1, %v938_v45 }
 0x1c9   : > { %1961 = vmatpush3.xpose.msk.msra.mxu0 %vm394_vm1, %v946_v44 }
 0x1ca   : > { %v942_v47 = vpop.permute.xlu0 %941 }
 0x1cc   : > { %1963 = vmatmul.mubr.msk.f32.vlgmr.msra.gmra.mxu0 %vm394_vm1, %v940_v46 }
 0x1cd   : > { %1965 = vmatprep.mubr.msk.f32.mxu0 %vm394_vm1, %v942_v47 }
 0x1d0   : > { %1966 = vmatmul.mubr.msk.f32.gmra.mxu0 %vm394_vm1, %v944_v48 }
 0x277   : > { %v1908_v54 = vpop.f32.mrf.mxu1 }
 0x278   : > { %v2635_v55 = vadd.f32 %v1908_v54, %v2632_v53 }
 0x279   : > { %v477_v59 = vpop.f32.mrf.mxu1 }
 0x27a   : > { %v500_v57 = vsel %vm496_vm3, %v2635_v55, -inf  ;;  %v2644_v1 = vadd.f32 %v477_v59, %v2640_v58 }
 0x27b   : > { %501 = vmax.xlane.f32.xlu1 %v500_v57  ;;  %v1911_v5 = vpop.f32.mrf.mxu1 }
 0x27c   : > { %v1936_v60 = vpop.f32.mrf.mxu0  ;;  %v493_v7 = vadd.f32 %v1911_v5, %v2651_v4  ;;  %v497_v8 = vsel %vm496_vm3, %v2644_v1, -inf }
 0x27d   : > { %v746_v61 = vadd.f32 %v1936_v60, %v2632_v53  ;;  %v487_v15 = vpop.f32.mrf.mxu1 }
 0x27e   : > { %v740_v63 = vpop.f32.mrf.mxu0  ;;  %v506_v14 = vsel %vm496_vm3, %v493_v7, -inf  ;;  %v2669_v17 = vadd.f32 %v487_v15, %v2659_v10 }
 0x27f   : > { %v2647_v2 = vadd.f32 %v740_v63, %v2640_v58  ;;  %v762_v3 = vsel %vm496_vm3, %v746_v61, -inf }
 0x280   : > { %763 = vmax.xlane.f32.xlu0 %v762_v3  ;;  %v503_v20 = vsel %vm496_vm3, %v2669_v17, -inf }
 0x281   : > { %v759_v6 = vsel %vm496_vm3, %v2647_v2, -inf }
 0x282   : > { %760 = vmax.xlane.f32.xlu1 %v759_v6 }
 0x283   : > { %v1939_v9 = vpop.f32.mrf.mxu0 }
 0x284   : > { %498 = vmax.xlane.f32.xlu0 %v497_v8  ;;  %v756_v13 = vadd.f32 %v1939_v9, %v2651_v4 }
 0x285   : > { %v750_v11 = vpop.f32.mrf.mxu0 }
 0x286   : > { %v2662_v12 = vadd.f32 %v750_v11, %v2659_v10  ;;  %v768_v0 = vsel %vm496_vm3, %v756_v13, -inf }
 0x288   : > { %507 = vmax.xlane.f32.xlu0 %v506_v14  ;;  %v765_v16 = vsel %vm496_vm3, %v2662_v12, -inf }
 0x289   : > { %766 = vmax.xlane.f32.xlu1 %v765_v16 }
 0x28c   : > { %769 = vmax.xlane.f32.xlu0 %v768_v0  ;;  %v1964_v18 = vpop.f32.mrf.mxu0 }
 0x28d   : > { %v1041_v19 = vadd.f32 %v1964_v18, %v2632_v53 }
 0x28e   : > { %v1035_v29 = vpop.f32.mrf.mxu0 }
 0x28f   : > { %v1057_v28 = vsel %vm496_vm3, %v1041_v19, -inf  ;;  %v2681_v30 = vadd.f32 %v1035_v29, %v2640_v58 }
 0x290   : > { %504 = vmax.xlane.f32.xlu0 %v503_v20  ;;  %v1967_v32 = vpop.f32.mrf.mxu0 }
 0x291   : > { %v1054_v31 = vsel %vm496_vm3, %v2681_v30, -inf  ;;  %v2686_v33 = vadd.f32 %v1967_v32, %v2651_v4 }
 0x292   : > { %v1045_v35 = vpop.f32.mrf.mxu0 }
 0x293   : > { %v1063_v34 = vsel %vm496_vm3, %v2686_v33, -inf  ;;  %v2701_v36 = vadd.f32 %v1045_v35, %v2659_v10 }
 0x294   : > { %1058 = vmax.xlane.f32.xlu0 %v1057_v28 }
 0x295   : > { %v1060_v38 = vsel %vm496_vm3, %v2701_v36, -inf }
 0x29a   : > { %811 = vrot.lane.b32.xlu1 %v2544_v26, %s2338_s10 }
 0x2aa   : > { %813 = vrot.lane.b32.xlu0 %v2595_v37, %s2338_s10 }
 0x2be   : > { %1055 = vmax.xlane.f32.xlu1 %v1054_v31 }
 0x2c9   : > { %1064 = vmax.xlane.f32.xlu0 %v1063_v34 }
 0x2cf   : > { %807 = vrot.lane.b32.xlu1 %v2535_v22, %s2338_s10 }
 0x2d3   : > { %1102 = vrot.lane.b32.xlu1 %v2544_v26, %s2339_s5 }
 0x2df   : > { %809 = vrot.lane.b32.xlu0 %v2539_v24, %s2338_s10 }
 0x2e3   : > { %1104 = vrot.lane.b32.xlu0 %v2595_v37, %s2339_s5 }
 0x2e7   : > { %1100 = vrot.lane.b32.xlu0 %v2539_v24, %s2339_s5 }
 0x2f7   : > { %1061 = vmax.xlane.f32.xlu1 %v1060_v38 }
 0x304   : > { %v502_v39 = vpop.xlane.xlu1 %501 }
 0x305   : > { %v510_v40 = vsub.f32 %v2635_v55, %v502_v39 }
 0x307   : > { %v515_v41 = vmul.f32 1.442695, %v510_v40 }
 0x308   : > { %1098 = vrot.lane.b32.xlu1 %v2535_v22, %s2339_s5 }
 0x309   : > { %2113 = vpow2.f32 %v515_v41  ;;  %v764_v42 = vpop.xlane.xlu0 %763 }
 0x30a   : > { %v772_v43 = vsub.f32 %v746_v61, %v764_v42 }
 0x30b   : > { %v761_v49 = vpop.xlane.xlu1 %760 }
 0x30c   : > { %v777_v44 = vmul.f32 1.442695, %v772_v43  ;;  %v771_v55 = vsub.f32 %v2647_v2, %v761_v49 }
 0x30d   : > { %v499_v45 = vpop.xlane.xlu0 %498 }
 0x30e   : > { %2115 = vpow2.f32 %v777_v44  ;;  %v509_v48 = vsub.f32 %v2644_v1, %v499_v45  ;;  %v775_v62 = vmul.f32 1.442695, %v771_v55 }
 0x310   : > { %v513_v56 = vmul.f32 1.442695, %v509_v48 }
 0x311   : > { %v508_v46 = vpop.xlane.xlu0 %507 }
 0x312   : > { %v512_v47 = vsub.f32 %v493_v7, %v508_v46  ;;  %v767_v1 = vpop.xlane.xlu1 %766 }
 0x313   : > { %v773_v6 = vsub.f32 %v2662_v12, %v767_v1 }
 0x314   : > { %v519_v50 = vmul.f32 1.442695, %v512_v47 }
 0x315   : > { %v770_v51 = vpop.xlane.xlu0 %769 }
 0x316   : > { %v2709_v52 = vpop.eup %2113  ;;  %2117 = vpow2.f32 %v519_v50  ;;  %v774_v54 = vsub.f32 %v756_v13, %v770_v51  ;;  %v779_v13 = vmul.f32 1.442695, %v773_v6  ;;  %v812_v34 = vpop.permute.xlu1 %811 }
 0x317   : > { %v524_v57 = vsel %vm496_vm3, %v2709_v52, 0.0 }
 0x318   : > { %v781_v59 = vmul.f32 1.442695, %v774_v54  ;;  %525 = vadd.xlane.f32.xlu0 %v524_v57 }
 0x319   : > { %v505_v60 = vpop.xlane.xlu0 %504 }
 0x31a   : > { %2119 = vpow2.f32 %v781_v59  ;;  %v511_v63 = vsub.f32 %v2669_v17, %v505_v60 }
 0x31b   : > { %v2714_v61 = vpop.eup %2115  ;;  %2121 = vpow2.f32 %v513_v56 }
 0x31c   : > { %v786_v3 = vsel %vm496_vm3, %v2714_v61, 0.0  ;;  %2123 = vpow2.f32 %v775_v62  ;;  %v517_v7 = vmul.f32 1.442695, %v511_v63 }
 0x31d   : > { %v1059_v5 = vpop.xlane.xlu0 %1058  ;;  %787 = vadd.xlane.f32.xlu0 %v786_v3 }
 0x31e   : > { %v1067_v2 = vsub.f32 %v1041_v19, %v1059_v5 }
 0x320   : > { %v1072_v8 = vmul.f32 1.442695, %v1067_v2 }
 0x321   : > { %v2720_v9 = vpop.permute.xlu0 %813 }
 0x322   : > { %2125 = vpow2.f32 %v1072_v8  ;;  %1940 = vmatprep.subr.mxu1 %v2720_v9 }
 0x323   : > { %v2723_v11 = vpop.eup %2117  ;;  %2127 = vpow2.f32 %v517_v7 }
 0x324   : > { %v530_v14 = vsel %vm496_vm3, %v2723_v11, 0.0  ;;  %2129 = vpow2.f32 %v779_v13 }
 0x325   : > { %531 = vadd.xlane.f32.xlu0 %v530_v14 }
 0x327   : > { %v2727_v15 = vpop.eup %2119 }
 0x328   : > { %v2729_v16 = vpop.eup %2121  ;;  %v792_v12 = vsel %vm496_vm3, %v2727_v15, 0.0 }
 0x329   : > { %793 = vadd.xlane.f32.xlu0 %v792_v12  ;;  %v521_v17 = vsel %vm496_vm3, %v2729_v16, 0.0  ;;  %v2735_v0 = vpop.eup %2123 }
 0x32a   : > { %v783_v19 = vsel %vm496_vm3, %v2735_v0, 0.0 }
 0x32c   : > { %522 = vadd.xlane.f32.xlu1 %v521_v17 }
 0x32f   : > { %v2737_v18 = vpop.eup %2125 }
 0x330   : > { %v2741_v20 = vpop.eup %2127  ;;  %v1081_v28 = vsel %vm496_vm3, %v2737_v18, 0.0  ;;  %784 = vadd.xlane.f32.xlu1 %v783_v19 }
 0x331   : > { %1082 = vadd.xlane.f32.xlu0 %v1081_v28  ;;  %v527_v29 = vsel %vm496_vm3, %v2741_v20, 0.0  ;;  %v2747_v31 = vpop.eup %2129 }
 0x332   : > { %v789_v32 = vsel %vm496_vm3, %v2747_v31, 0.0 }
 0x334   : > { %528 = vadd.xlane.f32.xlu1 %v527_v29 }
 0x338   : > { %790 = vadd.xlane.f32.xlu1 %v789_v32 }
 0x347   : > { %1242 = vrot.lane.b32.xlu0 %v2546_v27, %s2340_s7  ;;  %v1056_v35 = vpop.xlane.xlu1 %1055 }
 0x348   : > { %v1066_v38 = vsub.f32 %v2681_v30, %v1056_v35 }
 0x349   : > { %1240 = vrot.lane.b32.xlu1 %v2541_v25, %s2340_s7 }
 0x34a   : > { %v1070_v40 = vmul.f32 1.442695, %v1066_v38 }
 0x34b   : > { %1238 = vrot.lane.b32.xlu0 %v2537_v23, %s2340_s7  ;;  %v808_v30 = vpop.permute.xlu1 %807 }
 0x34c   : > { %2131 = vpow2.f32 %v1070_v40 }
 0x34d   : > { %1236 = vrot.lane.b32.xlu1 %v2531_v21, %s2340_s7 }
 0x34f   : > { %1228 = vrot.lane.b32.xlu0 %v2531_v21, %s2341_s11  ;;  %v2773_v45 = vpop.permute.xlu1 %1102 }
 0x352   : > { %v1065_v39 = vpop.xlane.xlu0 %1064 }
 0x353   : > { %1232 = vrot.lane.b32.xlu0 %v2541_v25, %s2341_s11  ;;  %v1069_v41 = vsub.f32 %v2686_v33, %v1065_v39 }
 0x355   : > { %v1076_v42 = vmul.f32 1.442695, %v1069_v41 }
 0x356   : > { %v810_v50 = vpop.permute.xlu0 %809 }
 0x357   : > { %2133 = vpow2.f32 %v1076_v42 }
 0x359   : > { %v2765_v43 = vpop.eup %2131 }
 0x35a   : > { %v1078_v44 = vsel %vm496_vm3, %v2765_v43, 0.0  ;;  %v1105_v51 = vpop.permute.xlu0 %1104 }
 0x35e   : > { %v1101_v54 = vpop.permute.xlu0 %1100 }
 0x364   : > { %v2769_v21 = vpop.eup %2133 }
 0x365   : > { %v1087_v25 = vsel %vm496_vm3, %v2769_v21, 0.0 }
 0x371   : > { %1079 = vadd.xlane.f32.xlu1 %v1078_v44 }
 0x375   : > { %1088 = vadd.xlane.f32.xlu1 %v1087_v25 }
 0x380   : > { %v1062_v46 = vpop.xlane.xlu1 %1061 }
 0x381   : > { %v1068_v33 = vsub.f32 %v2701_v36, %v1062_v46 }
 0x383   : > { %v1074_v47 = vmul.f32 1.442695, %v1068_v33 }
 0x384   : > { %v1099_v56 = vpop.permute.xlu1 %1098 }
 0x385   : > { %2135 = vpow2.f32 %v1074_v47 }
 0x392   : > { %v2776_v48 = vpop.eup %2135 }
 0x393   : > { %v1084_v49 = vsel %vm496_vm3, %v2776_v48, 0.0 }
 0x394   : > { %1085 = vadd.xlane.f32.xlu1 %v1084_v49 }
 0x3a1   : > { %v526_v55 = vpop.xlane.xlu0 %525 }
 0x3a2   : > { %2137 = vrcp.f32 %v526_v55 }
 0x3a5   : > { %1230 = vrot.lane.b32.xlu1 %v2537_v23, %s2341_s11 }
 0x3a6   : > { %v788_v36 = vpop.xlane.xlu0 %787 }
 0x3a9   : > { %1234 = vrot.lane.b32.xlu1 %v2546_v27, %s2341_s11 }
 0x3ae   : > { %v532_v59 = vpop.xlane.xlu0 %531 }
 0x3af   : > { %v2138_v1 = vpop.eup %2137 }
 0x3b0   : > { %v538_v5 = vmul.f32 %v2138_v1, %v2709_v52 }
 0x3b2   : > { %v794_v23 = vpop.xlane.xlu0 %793 }
 0x3b5   : > { %v523_v57 = vpop.xlane.xlu1 %522 }
 0x3b6   : > { %2139 = vrcp.f32 %v523_v57 }
 0x3b7   : > { %2141 = vrcp.f32 %v532_v59 }
 0x3b9   : > { %v785_v60 = vpop.xlane.xlu1 %784 }
 0x3ba   : > { %2143 = vrcp.f32 %v785_v60 }
 0x3bd   : > { %v529_v62 = vpop.xlane.xlu1 %528 }
 0x3be   : > { %2145 = vrcp.f32 %v529_v62 }
 0x3bf   : > { %2147 = vrcp.f32 %v788_v36 }
 0x3c1   : > { %v791_v63 = vpop.xlane.xlu1 %790 }
 0x3c2   : > { %2149 = vrcp.f32 %v791_v63 }
 0x3c3   : > { %v2140_v3 = vpop.eup %2139  ;;  %2151 = vrcp.f32 %v794_v23 }
 0x3c4   : > { %v537_v27 = vmul.f32 %v2140_v3, %v2729_v16  ;;  %v2142_v2 = vpop.eup %2141 }
 0x3c5   : > { %v540_v13 = vmul.f32 %v2142_v2, %v2723_v11  ;;  %v1083_v11 = vpop.xlane.xlu0 %1082  ;;  %v1241_v19 = vpop.permute.xlu1 %1240 }
 0x3c6   : > { %1920 = vmatprep.mubr.msk.f32.mxu1 %vm496_vm3, %v537_v27  ;;  %2153 = vrcp.f32 %v1083_v11 }
 0x3c7   : > { %1921 = vmatmul.mubr.msk.f32.vlgmr.msra.gmra.mxu1 %vm496_vm3, %v538_v5  ;;  %v2144_v6 = vpop.eup %2143 }
 0x3c8   : > { %1941 = vmatpush3.msra.mxu1 %v2720_v9  ;;  %v799_v14 = vmul.f32 %v2144_v6, %v2735_v0 }
 0x3c9   : > { %1942 = vmatprep.subr.mxu1 %v812_v34 }
 0x3ca   : > { %1943 = vmatpush3.msra.mxu1 %v812_v34 }
 0x3cb   : > { %v2146_v7 = vpop.eup %2145  ;;  %1944 = vmatprep.subr.mxu1 %v810_v50 }
 0x3cc   : > { %1945 = vmatpush3.msra.mxu1 %v810_v50  ;;  %v539_v8 = vmul.f32 %v2146_v7, %v2741_v20  ;;  %v2148_v52 = vpop.eup %2147  ;;  %v1237_v20 = vpop.permute.xlu1 %1236 }
 0x3cd   : > { %1946 = vmatprep.subr.mxu1 %v808_v30  ;;  %v800_v9 = vmul.f32 %v2148_v52, %v2714_v61  ;;  %v1243_v61 = vpop.permute.xlu0 %1242 }
 0x3ce   : > { %1947 = vmatpush3.msra.mxu1 %v808_v30  ;;  %1923 = vmatprep.mubr.msk.f32.mxu1 %vm496_vm3, %v539_v8 }
 0x3cf   : > { %v2150_v16 = vpop.eup %2149  ;;  %1968 = vmatprep.subr.mxu1 %v1105_v51  ;;  %1924 = vmatmul.mubr.msk.f32.gmra.mxu1 %vm496_vm3, %v540_v13 }
 0x3d0   : > { %1948 = vmatprep.mubr.msk.f32.mxu1 %vm496_vm3, %v799_v14  ;;  %v2152_v12 = vpop.eup %2151  ;;  %v801_v17 = vmul.f32 %v2150_v16, %v2747_v31 }
 0x3d1   : > { %v802_v0 = vmul.f32 %v2152_v12, %v2727_v15  ;;  %v1239_v34 = vpop.permute.xlu0 %1238 }
 0x3d3   : > { %1949 = vmatmul.mubr.msk.f32.vlgmr.msra.gmra.mxu1 %vm496_vm3, %v800_v9  ;;  %v2154_v29 = vpop.eup %2153 }
 0x3d4   : > { %1969 = vmatpush3.msra.mxu1 %v1105_v51  ;;  %1951 = vmatprep.mubr.msk.f32.mxu1 %vm496_vm3, %v801_v17  ;;  %v1095_v32 = vmul.f32 %v2154_v29, %v2737_v18 }
 0x3d5   : > { %1970 = vmatprep.subr.mxu1 %v2773_v45  ;;  %v1229_v41 = vpop.permute.xlu0 %1228 }
 0x3d6   : > { %1971 = vmatpush3.msra.mxu1 %v2773_v45 }
 0x3d7   : > { %1972 = vmatprep.subr.mxu1 %v1101_v54  ;;  %1952 = vmatmul.mubr.msk.f32.gmra.mxu1 %vm496_vm3, %v802_v0 }
 0x3d8   : > { %1973 = vmatpush3.msra.mxu1 %v1101_v54 }
 0x3d9   : > { %1974 = vmatprep.subr.mxu1 %v1099_v56  ;;  %v1233_v44 = vpop.permute.xlu0 %1232 }
 0x3da   : > { %1975 = vmatpush3.msra.mxu1 %v1099_v56 }
 0x3db   : > { %1982 = vmatprep.subr.msk.mxu1 %vm394_vm1, %v1243_v61 }
 0x3fa   : > { %v1080_v28 = vpop.xlane.xlu1 %1079 }
 0x3fb   : > { %2155 = vrcp.f32 %v1080_v28 }
 0x3fe   : > { %v1089_v35 = vpop.xlane.xlu1 %1088 }
 0x3ff   : > { %2157 = vrcp.f32 %v1089_v35 }
 0x408   : > { %v2156_v31 = vpop.eup %2155 }
 0x409   : > { %v1094_v15 = vmul.f32 %v2156_v31, %v2765_v43 }
 0x40b   : > { %1976 = vmatprep.mubr.msk.f32.mxu1 %vm496_vm3, %v1094_v15 }
 0x40c   : > { %1977 = vmatmul.mubr.msk.f32.vlgmr.msra.gmra.mxu1 %vm496_vm3, %v1095_v32  ;;  %v2158_v38 = vpop.eup %2157 }
 0x40d   : > { %1983 = vmatpush3.xpose.msk.msra.mxu1 %vm394_vm1, %v1243_v61  ;;  %v1097_v42 = vmul.f32 %v2158_v38, %v2769_v21 }
 0x40e   : > { %1984 = vmatprep.subr.msk.mxu1 %vm394_vm1, %v1241_v19 }
 0x411   : > { %1985 = vmatpush3.xpose.msk.msra.mxu1 %vm394_vm1, %v1241_v19 }
 0x412   : > { %1986 = vmatprep.subr.msk.mxu1 %vm394_vm1, %v1239_v34 }
 0x415   : > { %1987 = vmatpush3.xpose.msk.msra.mxu1 %vm394_vm1, %v1239_v34 }
 0x416   : > { %1988 = vmatprep.subr.msk.mxu1 %vm394_vm1, %v1237_v20 }
 0x419   : > { %1989 = vmatpush3.xpose.msk.msra.mxu1 %vm394_vm1, %v1237_v20 }
 0x41d   : > { %v1086_v18 = vpop.xlane.xlu1 %1085 }
 0x41e   : > { %2159 = vrcp.f32 %v1086_v18 }
 0x421   : > { %v1231_v43 = vpop.permute.xlu1 %1230 }
 0x425   : > { %v1235_v25 = vpop.permute.xlu1 %1234 }
 0x42b   : > { %v2160_v39 = vpop.eup %2159 }
 0x42c   : > { %v1096_v40 = vmul.f32 %v2160_v39, %v2776_v48 }
 0x42e   : > { %1979 = vmatprep.mubr.msk.f32.mxu1 %vm496_vm3, %v1096_v40 }
 0x42f   : > { %1980 = vmatmul.mubr.msk.f32.gmra.mxu1 %vm496_vm3, %v1097_v42 }
 0x430   : > { %1990 = vmatprep.mubr.msk.f32.mxu1 %vm394_vm1, %v1229_v41 }
 0x433   : > { %1991 = vmatmul.mubr.msk.f32.vlgmr.msra.gmra.mxu1 %vm394_vm1, %v1231_v43 }
 0x434   : > { %1993 = vmatprep.mubr.msk.f32.mxu1 %vm394_vm1, %v1233_v44 }
 0x437   : > { %1994 = vmatmul.mubr.msk.f32.gmra.mxu1 %vm394_vm1, %v1235_v25 }
 0x487   : > { %v1922_v30 = vpop.f32.mrf.mxu1 }
 0x488   : > { %639 = vst.msk [vmem:[#allocation2 + $0x8] sm:$0xff] %vm394_vm1, %v1922_v30 }
 0x489   : > { %v619_v45 = vpop.f32.mrf.mxu1 }
 0x48a   : > { %638 = vst.msk [vmem:[#allocation2] sm:$0xff] %vm394_vm1, %v619_v45 }
 0x48f   : > { %v1925_v21 = vpop.f32.mrf.mxu1 }
 0x490   : > { %641 = vst.msk [vmem:[#allocation2 + $0x18] sm:$0xff] %vm394_vm1, %v1925_v21 }
 0x491   : > { %v629_v46 = vpop.f32.mrf.mxu1 }
 0x492   : > { %640 = vst.msk [vmem:[#allocation2 + $0x10] sm:$0xff] %vm394_vm1, %v629_v46 }
 0x493   : > { %v1950_v33 = vpop.f32.mrf.mxu1 }
 0x495   : > { %v897_v47 = vpop.f32.mrf.mxu1 }
 0x497   : > { %v1953_v48 = vpop.f32.mrf.mxu1 }
 0x499   : > { %v907_v49 = vpop.f32.mrf.mxu1 }
 0x4cc   : > { %v1978_v50 = vpop.f32.mrf.mxu1 }
 0x4ce   : > { %v1188_v51 = vpop.f32.mrf.mxu1 }
 0x4ef   : > { %v1981_v54 = vpop.f32.mrf.mxu1 }
 0x4f1   : > { %v1198_v55 = vpop.f32.mrf.mxu1 }
 0x4f3   : > { %v1992_v56 = vpop.f32.mrf.mxu1 }
 0x4f4   : > { %v1332_v36 = vadd.f32 %v1992_v56, %v2632_v53 }
 0x4f5   : > { %v1326_v57 = vpop.f32.mrf.mxu1 }
 0x4f6   : > { %v1327_v59 = vadd.f32 %v1326_v57, %v2640_v58  ;;  %v1348_v60 = vsel %vm496_vm3, %v1332_v36, -inf }
 0x4f7   : > { %1349 = vmax.xlane.f32.xlu1 %v1348_v60  ;;  %v1995_v62 = vpop.f32.mrf.mxu1 }
 0x4f8   : > { %v1345_v63 = vsel %vm496_vm3, %v1327_v59, -inf  ;;  %v1342_v3 = vadd.f32 %v1995_v62, %v2651_v4 }
 0x4f9   : > { %v1336_v1 = vpop.f32.mrf.mxu1  ;;  %1346 = vmax.xlane.f32.xlu0 %v1345_v63 }
 0x4fa   : > { %v1337_v23 = vadd.f32 %v1336_v1, %v2659_v10  ;;  %v1354_v53 = vsel %vm496_vm3, %v1342_v3, -inf }
 0x4fc   : > { %v1351_v27 = vsel %vm496_vm3, %v1337_v23, -inf }
 0x4fd   : > { %1352 = vmax.xlane.f32.xlu0 %v1351_v27 }
 0x501   : > { %1355 = vmax.xlane.f32.xlu0 %v1354_v53 }
 0x508   : > { %1395 = vrot.lane.b32.xlu1 %v2595_v37, %s2341_s11 }
 0x580   : > { %v1350_v58 = vpop.xlane.xlu1 %1349 }
 0x581   : > { %v1358_v5 = vsub.f32 %v1332_v36, %v1350_v58  ;;  %v1810_v58 = vld [vmem:[%s2936_s3] ss:$0 sm:$0xff] }
 0x582   : > { %v1347_v2 = vpop.xlane.xlu0 %1346 }
 0x583   : > { %v1363_v6 = vmul.f32 1.442695, %v1358_v5  ;;  %v1357_v7 = vsub.f32 %v1327_v59, %v1347_v2 }
 0x584   : > { %v1396_v8 = vpop.permute.xlu1 %1395 }
 0x585   : > { %2161 = vpow2.f32 %v1363_v6  ;;  %v1361_v13 = vmul.f32 1.442695, %v1357_v7  ;;  %1996 = vmatprep.subr.mxu1 %v1396_v8 }
 0x586   : > { %1997 = vmatpush3.msra.mxu1 %v1396_v8  ;;  %v1353_v4 = vpop.xlane.xlu0 %1352 }
 0x587   : > { %2163 = vpow2.f32 %v1361_v13  ;;  %v1359_v0 = vsub.f32 %v1337_v23, %v1353_v4 }
 0x589   : > { %v1365_v61 = vmul.f32 1.442695, %v1359_v0 }
 0x58a   : > { %v1356_v10 = vpop.xlane.xlu0 %1355 }
 0x58b   : > { %v1360_v52 = vsub.f32 %v1342_v3, %v1356_v10 }
 0x58d   : > { %v1367_v14 = vmul.f32 1.442695, %v1360_v52 }
 0x58f   : > { %2165 = vpow2.f32 %v1367_v14 }
 0x590   : > { %2167 = vpow2.f32 %v1365_v61 }
 0x592   : > { %v2162_v16 = vpop.eup %2161 }
 0x593   : > { %v1372_v9 = vsel %vm496_vm3, %v2162_v16, 0.0 }
 0x594   : > { %v2164_v37 = vpop.eup %2163  ;;  %1373 = vadd.xlane.f32.xlu0 %v1372_v9 }
 0x595   : > { %v1369_v12 = vsel %vm496_vm3, %v2164_v37, 0.0 }
 0x596   : > { %1370 = vadd.xlane.f32.xlu1 %v1369_v12 }
 0x59c   : > { %v2166_v17 = vpop.eup %2165 }
 0x59d   : > { %v1378_v11 = vsel %vm496_vm3, %v2166_v17, 0.0  ;;  %v2168_v19 = vpop.eup %2167 }
 0x59e   : > { %1379 = vadd.xlane.f32.xlu0 %v1378_v11  ;;  %v1375_v20 = vsel %vm496_vm3, %v2168_v19, 0.0 }
 0x5a7   : > { %1391 = vrot.lane.b32.xlu1 %v2539_v24, %s2341_s11 }
 0x5b4   : > { %1393 = vrot.lane.b32.xlu0 %v2544_v26, %s2341_s11 }
 0x5b8   : > { %920 = vrot.lane.b32.xlu0 %v897_v47, %s2340_s7  ;;  %v1529_v47 = vld [vmem:[#allocation8 + $0x30] sm:$0xff] }
 0x5bc   : > { %1211 = vrot.lane.b32.xlu0 %v1188_v51, %s2337_s9  ;;  %v1525_v51 = vld [vmem:[#allocation8 + $0x10] sm:$0xff] }
 0x5c0   : > { %924 = vrot.lane.b32.xlu0 %v907_v49, %s2340_s7  ;;  %v1527_v49 = vld [vmem:[#allocation8 + $0x20] sm:$0xff] }
 0x5c4   : > { %1215 = vrot.lane.b32.xlu0 %v1198_v55, %s2337_s9  ;;  %v1523_v55 = vld [vmem:[#allocation8] sm:$0xff] }
 0x5cb   : > { %1376 = vadd.xlane.f32.xlu1 %v1375_v20 }
 0x5dc   : > { %1389 = vrot.lane.b32.xlu1 %v2535_v22, %s2341_s11 }
 0x5e0   : > { %922 = vrot.lane.b32.xlu1 %v1950_v33, %s2340_s7  ;;  %v1530_v33 = vld [vmem:[#allocation8 + $0x38] sm:$0xff] }
 0x5e1   : > { %2010 = vmatprep.subr.mxu0 %v1530_v33 }
 0x5e2   : > { %2011 = vmatpush3.msra.mxu0 %v1530_v33 }
 0x5e3   : > { %2012 = vmatprep.subr.mxu0 %v1529_v47 }
 0x5e4   : > { %1213 = vrot.lane.b32.xlu1 %v1978_v50, %s2337_s9  ;;  %2013 = vmatpush3.msra.mxu0 %v1529_v47  ;;  %v1526_v50 = vld [vmem:[#allocation8 + $0x18] sm:$0xff] }
 0x5e8   : > { %926 = vrot.lane.b32.xlu1 %v1953_v48, %s2340_s7  ;;  %v1528_v48 = vld [vmem:[#allocation8 + $0x28] sm:$0xff] }
 0x5e9   : > { %2014 = vmatprep.subr.mxu0 %v1528_v48 }
 0x5ea   : > { %2015 = vmatpush3.msra.mxu0 %v1528_v48 }
 0x5eb   : > { %2016 = vmatprep.subr.mxu0 %v1527_v49 }
 0x5ec   : > { %1217 = vrot.lane.b32.xlu1 %v1981_v54, %s2337_s9  ;;  %2017 = vmatpush3.msra.mxu0 %v1527_v49  ;;  %v1524_v54 = vld [vmem:[#allocation8 + $0x8] sm:$0xff] }
 0x5ed   : > { %2018 = vmatprep.subr.mxu0 %v1526_v50 }
 0x5ee   : > { %2019 = vmatpush3.msra.mxu0 %v1526_v50 }
 0x5ef   : > { %2020 = vmatprep.subr.mxu0 %v1525_v51 }
 0x5f0   : > { %2021 = vmatpush3.msra.mxu0 %v1525_v51 }
 0x5f1   : > { %2022 = vmatprep.subr.mxu0 %v1524_v54 }
 0x5f2   : > { %2023 = vmatpush3.msra.mxu0 %v1524_v54 }
 0x5f3   : > { %2024 = vmatprep.subr.mxu0 %v1523_v55 }
 0x5f4   : > { %2025 = vmatpush3.msra.mxu0 %v1523_v55 }
 0x61d   : > { %v1374_v26 = vpop.xlane.xlu0 %1373 }
 0x61f   : > { %v1371_v24 = vpop.xlane.xlu1 %1370 }
 0x620   : > { %2169 = vrcp.f32 %v1371_v24 }
 0x621   : > { %2171 = vrcp.f32 %v1374_v26 }
 0x623   : > { %v1392_v15 = vpop.permute.xlu1 %1391 }
 0x627   : > { %v1380_v28 = vpop.xlane.xlu0 %1379 }
 0x628   : > { %2173 = vrcp.f32 %v1380_v28 }
 0x62b   : > { %v1394_v29 = vpop.permute.xlu0 %1393 }
 0x62c   : > { %1998 = vmatprep.subr.mxu1 %v1394_v29 }
 0x62d   : > { %v2170_v31 = vpop.eup %2169  ;;  %1999 = vmatpush3.msra.mxu1 %v1394_v29 }
 0x62e   : > { %2000 = vmatprep.subr.mxu1 %v1392_v15  ;;  %v1385_v22 = vmul.f32 %v2170_v31, %v2164_v37  ;;  %v2172_v39 = vpop.eup %2171 }
 0x62f   : > { %2001 = vmatpush3.msra.mxu1 %v1392_v15  ;;  %v921_v32 = vpop.permute.xlu0 %920  ;;  %v1386_v41 = vmul.f32 %v2172_v39, %v2162_v16 }
 0x630   : > { %933 = vst.msk [vmem:[#allocation2] sm:$0xff] %vm932_vm7, %v921_v32  ;;  %2004 = vmatprep.mubr.msk.f32.mxu1 %vm496_vm3, %v1385_v22 }
 0x633   : > { %v1212_v34 = vpop.permute.xlu0 %1211 }
 0x634   : > { %1224 = vst.msk [vmem:[#allocation2] sm:$0xff] %vm1223_vm8, %v1212_v34 }
 0x635   : > { %v2174_v44 = vpop.eup %2173 }
 0x636   : > { %v1388_v21 = vmul.f32 %v2174_v44, %v2166_v17 }
 0x637   : > { %v925_v35 = vpop.permute.xlu0 %924 }
 0x638   : > { %935 = vst.msk [vmem:[#allocation2 + $0x10] sm:$0xff] %vm932_vm7, %v925_v35 }
 0x63b   : > { %v1216_v18 = vpop.permute.xlu0 %1215 }
 0x63c   : > { %1226 = vst.msk [vmem:[#allocation2 + $0x10] sm:$0xff] %vm1223_vm8, %v1216_v18 }
 0x654   : > { %v1377_v38 = vpop.xlane.xlu1 %1376 }
 0x655   : > { %2175 = vrcp.f32 %v1377_v38 }
 0x658   : > { %v1390_v40 = vpop.permute.xlu1 %1389 }
 0x659   : > { %2002 = vmatprep.subr.mxu1 %v1390_v40 }
 0x65a   : > { %2003 = vmatpush3.msra.mxu1 %v1390_v40 }
 0x65b   : > { %2005 = vmatmul.mubr.msk.f32.vlgmr.msra.gmra.mxu1 %vm496_vm3, %v1386_v41 }
 0x65c   : > { %v923_v42 = vpop.permute.xlu1 %922 }
 0x65d   : > { %934 = vst.msk [vmem:[#allocation2 + $0x8] sm:$0xff] %vm932_vm7, %v923_v42 }
 0x660   : > { %v1214_v43 = vpop.permute.xlu1 %1213 }
 0x661   : > { %1225 = vst.msk [vmem:[#allocation2 + $0x8] sm:$0xff] %vm1223_vm8, %v1214_v43 }
 0x662   : > { %v2176_v25 = vpop.eup %2175 }
 0x663   : > { %v1387_v30 = vmul.f32 %v2176_v25, %v2168_v19 }
 0x664   : > { %v927_v45 = vpop.permute.xlu1 %926 }
 0x665   : > { %936 = vst.msk [vmem:[#allocation2 + $0x18] sm:$0xff] %vm932_vm7, %v927_v45  ;;  %2007 = vmatprep.mubr.msk.f32.mxu1 %vm496_vm3, %v1387_v30 }
 0x666   : > { %2008 = vmatmul.mubr.msk.f32.gmra.mxu1 %vm496_vm3, %v1388_v21 }
 0x668   : > { %v1218_v46 = vpop.permute.xlu1 %1217 }
 0x669   : > { %1227 = vst.msk [vmem:[#allocation2 + $0x18] sm:$0xff] %vm1223_vm8, %v1218_v46 }
 0x71b   : > { %v2006_v56 = vpop.f32.mrf.mxu1 }
 0x71c   : > { %1504 = vrot.lane.b32.xlu1 %v2006_v56, %s2336_s23 }
 0x71d   : > { %v1479_v36 = vpop.f32.mrf.mxu1 }
 0x71e   : > { %1502 = vrot.lane.b32.xlu0 %v1479_v36, %s2336_s23 }
 0x726   : > { %v2009_v57 = vpop.f32.mrf.mxu1 }
 0x727   : > { %1508 = vrot.lane.b32.xlu1 %v2009_v57, %s2336_s23 }
 0x728   : > { %v1489_v59 = vpop.f32.mrf.mxu1 }
 0x729   : > { %1506 = vrot.lane.b32.xlu0 %v1489_v59, %s2336_s23  ;;  %s2261_s23 = sshll.u32 %s2342_s21, 4  ;;  %s2262_s23 = int_to_ptr.vmem [resolvable:$false] %s2261_s23 }
 0x72a   : > { %s2263_s9 = scalar_lea.vmem %s2262_s23, 1024  ;;  %p2264_p6 = scmp.lt.s32.totalorder %s2883_s30, %s2262_s23 }
 0x72b   : > { %p2265_p12 = scmp.lt.s32.totalorder %s2263_s9, %s2257_s19 }
 0x72d   : > { %p2266_p3 = por %p2265_p12, %p2264_p6 }
 0x72f   : > { %p2267_p9 = pnand %p2266_p3, %p2260_p2 }
 0x78e   : > { %v1505_v60 = vpop.permute.xlu1 %1504 }
 0x78f   : > { %1516 = vst.msk [vmem:[#allocation2 + $0x8] sm:$0xff] %vm1514_vm9, %v1505_v60 }
 0x790   : > { %v1503_v62 = vpop.permute.xlu0 %1502 }
 0x791   : > { %1515 = vst.msk [vmem:[#allocation2] sm:$0xff] %vm1514_vm9, %v1503_v62 }
 0x796   : > { %v1520_v23 = vld [vmem:[#allocation2 + $0x8] sm:$0xff] }
 0x798   : > { %v1519_v63 = vld [vmem:[#allocation2] sm:$0xff] }
 0x799   : > { %v1509_v1 = vpop.permute.xlu1 %1508  ;;  %2026 = vmatprep.mubr.msk.f32.mxu0 %vm265_vm0, %v1519_v63 }
 0x79a   : > { %1518 = vst.msk [vmem:[#allocation2 + $0x18] sm:$0xff] %vm1514_vm9, %v1509_v1  ;;  %2027 = vmatmul.mubr.msk.f32.vlgmr.msra.gmra.mxu0 %vm265_vm0, %v1520_v23 }
 0x79b   : > { %v1507_v3 = vpop.permute.xlu0 %1506 }
 0x79c   : > { %1517 = vst.msk [vmem:[#allocation2 + $0x10] sm:$0xff] %vm1514_vm9, %v1507_v3 }
 0x7a1   : > { %v1522_v53 = vld [vmem:[#allocation2 + $0x18] sm:$0xff] }
 0x7a3   : > { %v1521_v27 = vld [vmem:[#allocation2 + $0x10] sm:$0xff] }
 0x7a4   : > { %2029 = vmatprep.mubr.msk.f32.mxu0 %vm265_vm0, %v1521_v27 }
 0x7a5   : > { %2030 = vmatmul.mubr.msk.f32.gmra.mxu0 %vm265_vm0, %v1522_v53 }
 0x85a   : > { %v2028_v5 = vpop.f32.mrf.mxu0 }
 0x85b   : > { %v1622_v2 = vadd.f32 %v2028_v5, %v1810_v58 }
 0x85c   : > { %v1616_v6 = vpop.f32.mrf.mxu0 }
 0x85d   : > { %1636 = vst.msk [vmem:[%s244_s26 + $0x8] sm:$0xff] %vm265_vm0, %v1622_v2  ;;  %v1617_v7 = vadd.f32 %v1810_v58, %v1616_v6 }
 0x85f   : > { %1635 = vst.msk [vmem:[%s244_s26] sm:$0xff] %vm265_vm0, %v1617_v7 }
 0x865   : > { %v2031_v8 = vpop.f32.mrf.mxu0 }
 0x866   : > { %v1632_v13 = vadd.f32 %v2031_v8, %v1810_v58 }
 0x867   : > { %v1626_v4 = vpop.f32.mrf.mxu0 }
 0x868   : > { %1638 = vst.msk [vmem:[%s244_s26 + $0x18] sm:$0xff] %vm265_vm0, %v1632_v13  ;;  %v1627_v10 = vadd.f32 %v1810_v58, %v1626_v4 }
 0x86a   : > { %1637 = vst.msk [vmem:[%s244_s26 + $0x10] sm:$0xff] %vm265_vm0, %v1627_v10 }
 0x86b   : > { %2270 = shalt.err (!%p2267_p9)
}
 0x86c   : > { %s2271_s10 = scalar_lea.hbm %s2888_s20, 512  ;;  %s2275_s11 = scalar_lea.hbm %s2937_s4, 1024 }
 0x86d   : > { %p2272_p13 = scmp.ne.s32.totalorder %s2888_s20, %s2271_s10  ;;  %p2276_p4 = scmp.lt.s32.totalorder %s2888_s20, %s2937_s4 }
 0x86e   : > { %p2277_p8 = scmp.lt.s32.totalorder %s2275_s11, %s2271_s10 }
 0x86f   : > { %p2273_p5 = pnand %p2272_p13, %p2953_p10 }
 0x870   : > { %p2278_p7 = por %p2277_p8, %p2276_p4 }
 0x871   : > { %p2274_p0 = pneg %p2273_p5 }
 0x873   : > { %p2279_p11 = pnand %p2278_p7, %p2274_p0 }
 0x875   : > { %2282 = shalt.err (!%p2279_p11)
}
 0x876   : > { %s2343_s26 = smov 128   ;;  %s2344_s6 = smov 8  }
 0x877   : > { %2042 = dma.vmem_to_hbm [thread:$0]  (%p2953_p10), %s2883_s30, 512, %s2888_s20, %s1640_s8, %s2343_s26, %s2343_s26, %s2344_s6  }
 0x878 PF: > { %s1668_s14 = sand.u32 1, %s2313_s15   ;;  %p2954_p1 = scmp.ne.s32.totalorder %s2943_s22, 0 }
 0x879   : > { %p2955_p2 = scmp.ge.s32.totalorder %s2325_s18, 2  ;;  %s1669_s27 = scalar_lea.sflag [#allocation5], %s1668_s14 }
 0x87b   : > { %p2056_p6 = pnand %p2955_p2, %p2954_p1 }
 0x87d   : > { %p2057_p12 = pneg %p2056_p6 }
 0x87f   : > { %2308 = dma.done.wait (%p2057_p12), %s1669_s27, 512  }
 0x880   : > { %2310 = vsyncadd (%p2057_p12), %s1669_s27, 4294966784  ;;  %p18_p3 = scmp.ge.s32.totalorder %s2445_s13, 4   ;;  %s2956_s15 = smov %s2317_s16 }
 0x881   : > { %s2957_s16 = smov %s2321_s17  ;;  %s2958_s17 = smov %s2454_s24 }
 0x882   : > { %s2959_s18 = smov %s2445_s13  ;;  %20 = sbr.rel (!%p18_p3) target bundleno = 6 (0x6), region = 89 }
 0x887   :  { %1674 = vsyncpa [#allocation4], 1 }
 0x888   :  { %1676 = vsyncpa [#allocation4 + $0x1], 1 }
 0x889   :  { %1677 = vsyncpa [#allocation7], 1 }
 0x88a   :  { %1678 = vsyncpa [#allocation5], 1 }
 0x88b   :  { %1680 = vsyncpa [#allocation5 + $0x1], 1 }

</bundles_post_ra>
